<compile_context>
chip_gen: v7x
topology: tpu7x:2x2x1
jax: 0.10.0
libtpu: 0.0.40
codegen_flags: <defaults>
</compile_context>

<pallas_src>
import functools

import jax
import jax.numpy as jnp
import numpy as np
from jax import lax
from jax.experimental import pallas as pl
from jax.experimental.pallas import tpu as pltpu


def _round_up(v, m):
    return ((v + m - 1) // m) * m


def _cdiv(a, b):
    return (a + b - 1) // b


def _id_loss_kernel(logits_ref, labels_ref, out_ref, acc_ref, *,
                    c, pack, alpha, gamma, use_focal_loss):
    """Grid = (parallel core slot, row-block).  acc_ref: (row_block, 1) f32."""
    i = pl.program_id(1)

    @pl.when(i == 0)
    def _init():
        acc_ref[...] = jnp.zeros_like(acc_ref)

    x = logits_ref[...].astype(jnp.float32)           # (TR, W)
    labels = labels_ref[...]                          # (TR, pack) int32, -1 = invalid row
    col = lax.broadcasted_iota(jnp.int32, x.shape, 1)

    # One-hot targets over the lane dim + per-lane row-validity mask.
    if pack == 1:
        targets = (col == labels).astype(jnp.float32)          # labels (TR,1) broadcasts
        valid_lane = labels >= 0                                # (TR,1), broadcasts
    else:
        targets = jnp.zeros(x.shape, jnp.float32)
        valid_lane = jnp.zeros(x.shape, dtype=jnp.bool_)
        for s in range(pack):                                   # unrolled at trace time
            lab_s = labels[:, s:s + 1]                          # (TR,1)
            targets = targets + (col == lab_s).astype(jnp.float32)
            band = jnp.logical_and(col >= s * c, col < (s + 1) * c)
            valid_lane = jnp.logical_or(valid_lane,
                                        jnp.logical_and(band, lab_s >= 0))

    if use_focal_loss:
        # Shared exp: e = exp(-|x|) serves both sigmoid(x) and softplus(-|x|).
        e = jnp.exp(-jnp.abs(x))
        denom = 1.0 + e
        inv = 1.0 / denom
        prob = jnp.where(x >= 0, inv, e * inv)                  # sigmoid(x), stable
        ce = jnp.maximum(x, 0.0) - x * targets + jnp.log(denom)  # BCE-with-logits
        p_t = prob * targets + (1.0 - prob) * (1.0 - targets)
        q = 1.0 - p_t
        if gamma == 2.0:
            mod = q * q                                         # avoid pow (exp+log)
        elif gamma == 1.0:
            mod = q
        elif gamma == 0.0:
            mod = jnp.ones_like(q)
        else:
            mod = q ** gamma
        loss = ce * mod
        if alpha >= 0:
            alpha_t = alpha * targets + (1.0 - alpha) * (1.0 - targets)
            loss = alpha_t * loss
        contrib = jnp.where(valid_lane, loss, 0.0)
        acc_ref[...] += jnp.sum(contrib, axis=1, keepdims=True)
    else:
        # Cross entropy (pack == 1, width == c): per-row logsumexp.
        m = jnp.max(x, axis=1, keepdims=True)
        lse = m + jnp.log(jnp.sum(jnp.exp(x - m), axis=1, keepdims=True))
        x_at = jnp.sum(x * targets, axis=1, keepdims=True)
        row_loss = lse - x_at
        acc_ref[...] += jnp.where(valid_lane, row_loss, 0.0)

    @pl.when(i == pl.num_programs(1) - 1)
    def _finalize():
        total = jnp.sum(acc_ref[...])
        lane = lax.broadcasted_iota(jnp.int32, out_ref.shape, 1)
        out_ref[...] = jnp.where(lane == 0, total, 0.0)


def id_criterion_forward(id_logits, id_labels, id_masks, *,
                         use_focal_loss=True, alpha=0.25, gamma=2.0,
                         num_cores=2, row_block=None,
                         vmem_budget_bytes=8 * 1024 * 1024):
    """JAX/Pallas equivalent of IDCriterion.forward (single device)."""
    b, g, t, n, c = id_logits.shape

    # Drop t = 0 (same as [:, :, 1:, ...]) and flatten rows.
    rows = b * g * (t - 1) * n
    flat_logits = id_logits[:, :, 1:, :, :].reshape(rows, c)      # keep native dtype
    flat_labels = id_labels[:, :, 1:, :].reshape(rows).astype(jnp.int32)
    flat_valid = jnp.logical_not(id_masks[:, :, 1:, :].reshape(rows))

    # num_ids == number of unmasked rows (tiny reduction, done outside the kernel).
    count = jnp.sum(flat_valid.astype(jnp.float32))

    # Lane packing: fold several rows into one 128-lane row when c is small.
    if use_focal_loss and c < 128 and 128 % c == 0 and (128 // c) <= 16:
        pack = 128 // c
    else:
        pack = 1
    width = pack * c

    # Fold validity into labels: valid in-range -> class idx, valid out-of-range
    # -> 'width' (never matches a lane but still counted), masked row -> -1.
    in_range = jnp.logical_and(flat_labels >= 0, flat_labels < c)
    lab_safe = jnp.where(in_range, flat_labels, jnp.int32(width))
    lab_enc = jnp.where(flat_valid, lab_safe, jnp.int32(-1))

    # Tiling: leading parallel axis of size P (per-TensorCore on v7x; harmless on
    # single-core chips), row blocks sized from a VMEM budget.
    P = max(1, int(num_cores))
    packed_rows = max(1, _cdiv(rows, pack))
    per_core = _cdiv(packed_rows, P)

    if row_block is None:
        itemsize = jnp.dtype(id_logits.dtype).itemsize
        bytes_per_row = 2 * width * itemsize + 512      # double-buffered input + acc
        rb_cap = max(8, min(2048, (vmem_budget_bytes // bytes_per_row) // 8 * 8))
    else:
        rb_cap = max(8, _round_up(int(row_block), 8))
    rb = min(rb_cap, _round_up(per_core, 8))
    blocks_per_core = max(1, _cdiv(per_core, rb))
    packed_rows_p = P * blocks_per_core * rb
    rows_p = packed_rows_p * pack
    pad = rows_p - rows

    # NOTE: this reshape/pad is the only extra HBM pass; reading the original
    # 5-D tensor directly via a t-offset index_map would remove it too.
    logits_p = jnp.pad(flat_logits, ((0, pad), (0, 0))) if pad else flat_logits
    labels_p = jnp.pad(lab_enc, (0, pad), constant_values=-1) if pad else lab_enc

    logits_in = logits_p.reshape(packed_rows_p, width)
    if pack > 1:
        lab2 = labels_p.reshape(packed_rows_p, pack)
        offs = (jnp.arange(pack, dtype=jnp.int32) * c)[None, :]
        labels_in = jnp.where(lab2 >= 0, lab2 + offs, jnp.int32(-1))
    else:
        labels_in = labels_p.reshape(packed_rows_p, 1)

    kernel = functools.partial(
        _id_loss_kernel, c=c, pack=pack, alpha=float(alpha),
        gamma=float(gamma), use_focal_loss=use_focal_loss)

    def row_map(p, i):
        return (p * blocks_per_core + i, 0)

    partials = pl.pallas_call(
        kernel,
        out_shape=jax.ShapeDtypeStruct((1, 128 * P), jnp.float32),
        grid_spec=pltpu.PrefetchScalarGridSpec(
            num_scalar_prefetch=0,
            grid=(P, blocks_per_core),
            in_specs=[
                pl.BlockSpec((rb, width), row_map),
                pl.BlockSpec((rb, pack), row_map),
            ],
            out_specs=pl.BlockSpec((1, 128), lambda p, i: (0, p)),
            scratch_shapes=[pltpu.VMEM((rb, 1), jnp.float32)],
        ),
        compiler_params=pltpu.CompilerParams(
            dimension_semantics=("parallel", "arbitrary"),
            vmem_limit_bytes=32 * 1024 * 1024),
    )(logits_in, labels_in)

    loss_total = jnp.sum(partials)
    if use_focal_loss:
        loss_total = loss_total / jnp.float32(c)   # mean over class dim
    # TODO(synk): distributed all_reduce(num_ids) / world_size omitted (single device).
    num_ids = jnp.maximum(count, 1.0)
    return loss_total / num_ids


def _reference(id_logits, id_labels, id_masks, *, use_focal_loss,
               alpha=0.25, gamma=2.0):
    """Pure-JAX reference mirroring the PyTorch module (for verification)."""
    b, g, t, n, c = id_logits.shape
    logits = id_logits[:, :, 1:, :, :].reshape(-1, c).astype(jnp.float32)
    labels = id_labels[:, :, 1:, :].reshape(-1)
    valid = jnp.logical_not(id_masks[:, :, 1:, :].reshape(-1)).astype(jnp.float32)
    one_hot = jax.nn.one_hot(labels, c, dtype=jnp.float32)
    if use_focal_loss:
        prob = jax.nn.sigmoid(logits)
        ce = jnp.maximum(logits, 0) - logits * one_hot + jnp.log1p(jnp.exp(-jnp.abs(logits)))
        p_t = prob * one_hot + (1 - prob) * (1 - one_hot)
        loss = ce * (1 - p_t) ** gamma
        alpha_t = alpha * one_hot + (1 - alpha) * (1 - one_hot)
        row_loss = jnp.mean(alpha_t * loss, axis=1)
    else:
        logp = jax.nn.log_softmax(logits, axis=-1)
        row_loss = -jnp.sum(logp * one_hot, axis=1)
    loss = jnp.sum(row_loss * valid)
    num_ids = jnp.maximum(jnp.sum(valid), 1.0)
    return loss / num_ids


if __name__ == "__main__":
    key = jax.random.PRNGKey(0)
    b, g, t, n = 2, 2, 4, 8
    cases = [
        dict(c=32, use_focal_loss=True, row_block=None),   # packed focal (pack=4)
        dict(c=32, use_focal_loss=False, row_block=None),  # cross entropy
        dict(c=32, use_focal_loss=True, row_block=8),      # multi-block accumulation
        dict(c=32, use_focal_loss=False, row_block=8),
        dict(c=48, use_focal_loss=True, row_block=None),   # c not a divisor of 128
    ]

    ok = True
    for cfg in cases:
        c = cfg["c"]
        k1, k2, k3, key = jax.random.split(key, 4)
        id_logits = jax.random.normal(k1, (b, g, t, n, c), dtype=jnp.float32)
        id_labels = jax.random.randint(k2, (b, g, t, n), 0, c, dtype=jnp.int32)
        id_masks = jax.random.bernoulli(k3, 0.3, (b, g, t, n))

        out = id_criterion_forward(id_logits, id_labels, id_masks,
                                   use_focal_loss=cfg["use_focal_loss"],
                                   row_block=cfg["row_block"])
        out = jax.block_until_ready(out)
        ref = jax.block_until_ready(
            _reference(id_logits, id_labels, id_masks,
                       use_focal_loss=cfg["use_focal_loss"]))
        if not np.allclose(np.asarray(out), np.asarray(ref), rtol=1e-3, atol=1e-4):
            ok = False
            print(f"mismatch {cfg}: kernel={out} ref={ref}")

    if ok:
        print("KERNEL_OK")
</pallas_src>

<mosaic_0001>
module attributes {stable_mosaic.version = 11 : i64} {
  func.func @_id_loss_kernel(%arg0: i32, %arg1: i32, %arg2: memref<16x128xf32, #tpu.memory_space<vmem>>, %arg3: memref<16x4xi32, #tpu.memory_space<vmem>>, %arg4: memref<1x128xf32, #tpu.memory_space<vmem>>, %arg5: memref<16x1xf32, #tpu.memory_space<vmem>>) attributes {dimension_semantics = [#tpu.dimension_semantics<parallel>, #tpu.dimension_semantics<arbitrary>], iteration_bounds = array<i64: 2, 1>, scalar_prefetch = 0 : i64, scratch_operands = 1 : i64, tpu.core_type = #tpu.core_type<tc>, window_params = [{transform_indices = @transform_0, window_bounds = array<i64: 16, 128>}, {transform_indices = @transform_1, window_bounds = array<i64: 16, 4>}, {transform_indices = @transform_2, window_bounds = array<i64: 1, 128>}]} {
    %c0_i32 = arith.constant 0 : i32
    %0 = arith.cmpi eq, %arg1, %c0_i32 : i32
    %1 = arith.extui %0 : i1 to i32
    %c0_i32_0 = arith.constant 0 : i32
    %2 = arith.cmpi ne, %1, %c0_i32_0 : i32
    scf.if %2 {
      %cst_31 = arith.constant 0.000000e+00 : f32
      %119 = vector.broadcast %cst_31 : f32 to vector<16x1xf32>
      %c0_32 = arith.constant 0 : index
      %c0_33 = arith.constant 0 : index
      %120 = vector.load %arg5[%c0_32, %c0_33] : memref<16x1xf32, #tpu.memory_space<vmem>>, vector<16x1xf32>
      tpu.vector_store %arg5[%c0_32, %c0_33], %119 {strides = array<i32>} : memref<16x1xf32, #tpu.memory_space<vmem>>, vector<16x1xf32>,
    } else {
    }
    %c0 = arith.constant 0 : index
    %c0_1 = arith.constant 0 : index
    %3 = vector.load %arg2[%c0, %c0_1] : memref<16x128xf32, #tpu.memory_space<vmem>>, vector<16x128xf32>
    %c0_2 = arith.constant 0 : index
    %c0_3 = arith.constant 0 : index
    %4 = vector.load %arg3[%c0_2, %c0_3] : memref<16x4xi32, #tpu.memory_space<vmem>>, vector<16x4xi32>
    %5 = tpu.iota {dimensions = array<i32: 1>} : vector<16x128xi32>
    %cst = arith.constant 0.000000e+00 : f32
    %6 = vector.broadcast %cst : f32 to vector<16x128xf32>
    %false = arith.constant false
    %7 = vector.broadcast %false : i1 to vector<16x128xi1>
    %8 = vector.extract_strided_slice %4 {offsets = [0, 0], sizes = [16, 1], strides = [1, 1]} : vector<16x4xi32> to vector<16x1xi32>
    %9 = vector.broadcast %8 : vector<16x1xi32> to vector<16x128xi32>
    %10 = arith.cmpi eq, %5, %9 : vector<16x128xi32>
    %11 = arith.extui %10 : vector<16x128xi1> to vector<16x128xi32>
    %12 = arith.sitofp %11 : vector<16x128xi32> to vector<16x128xf32>
    %13 = arith.addf %6, %12 : vector<16x128xf32>
    %c0_i32_4 = arith.constant 0 : i32
    %14 = vector.broadcast %c0_i32_4 : i32 to vector<16x128xi32>
    %15 = arith.cmpi sge, %5, %14 : vector<16x128xi32>
    %c32_i32 = arith.constant 32 : i32
    %16 = vector.broadcast %c32_i32 : i32 to vector<16x128xi32>
    %17 = arith.cmpi slt, %5, %16 : vector<16x128xi32>
    %18 = arith.andi %15, %17 : vector<16x128xi1>
    %c0_i32_5 = arith.constant 0 : i32
    %19 = vector.broadcast %c0_i32_5 : i32 to vector<16x1xi32>
    %20 = arith.cmpi sge, %8, %19 : vector<16x1xi32>
    %21 = vector.broadcast %20 : vector<16x1xi1> to vector<16x128xi1>
    %22 = arith.andi %18, %21 : vector<16x128xi1>
    %23 = arith.ori %7, %22 : vector<16x128xi1>
    %24 = vector.extract_strided_slice %4 {offsets = [0, 1], sizes = [16, 1], strides = [1, 1]} : vector<16x4xi32> to vector<16x1xi32>
    %25 = vector.broadcast %24 : vector<16x1xi32> to vector<16x128xi32>
    %26 = arith.cmpi eq, %5, %25 : vector<16x128xi32>
    %27 = arith.extui %26 : vector<16x128xi1> to vector<16x128xi32>
    %28 = arith.sitofp %27 : vector<16x128xi32> to vector<16x128xf32>
    %29 = arith.addf %13, %28 : vector<16x128xf32>
    %c32_i32_6 = arith.constant 32 : i32
    %30 = vector.broadcast %c32_i32_6 : i32 to vector<16x128xi32>
    %31 = arith.cmpi sge, %5, %30 : vector<16x128xi32>
    %c64_i32 = arith.constant 64 : i32
    %32 = vector.broadcast %c64_i32 : i32 to vector<16x128xi32>
    %33 = arith.cmpi slt, %5, %32 : vector<16x128xi32>
    %34 = arith.andi %31, %33 : vector<16x128xi1>
    %c0_i32_7 = arith.constant 0 : i32
    %35 = vector.broadcast %c0_i32_7 : i32 to vector<16x1xi32>
    %36 = arith.cmpi sge, %24, %35 : vector<16x1xi32>
    %37 = vector.broadcast %36 : vector<16x1xi1> to vector<16x128xi1>
    %38 = arith.andi %34, %37 : vector<16x128xi1>
    %39 = arith.ori %23, %38 : vector<16x128xi1>
    %40 = vector.extract_strided_slice %4 {offsets = [0, 2], sizes = [16, 1], strides = [1, 1]} : vector<16x4xi32> to vector<16x1xi32>
    %41 = vector.broadcast %40 : vector<16x1xi32> to vector<16x128xi32>
    %42 = arith.cmpi eq, %5, %41 : vector<16x128xi32>
    %43 = arith.extui %42 : vector<16x128xi1> to vector<16x128xi32>
    %44 = arith.sitofp %43 : vector<16x128xi32> to vector<16x128xf32>
    %45 = arith.addf %29, %44 : vector<16x128xf32>
    %c64_i32_8 = arith.constant 64 : i32
    %46 = vector.broadcast %c64_i32_8 : i32 to vector<16x128xi32>
    %47 = arith.cmpi sge, %5, %46 : vector<16x128xi32>
    %c96_i32 = arith.constant 96 : i32
    %48 = vector.broadcast %c96_i32 : i32 to vector<16x128xi32>
    %49 = arith.cmpi slt, %5, %48 : vector<16x128xi32>
    %50 = arith.andi %47, %49 : vector<16x128xi1>
    %c0_i32_9 = arith.constant 0 : i32
    %51 = vector.broadcast %c0_i32_9 : i32 to vector<16x1xi32>
    %52 = arith.cmpi sge, %40, %51 : vector<16x1xi32>
    %53 = vector.broadcast %52 : vector<16x1xi1> to vector<16x128xi1>
    %54 = arith.andi %50, %53 : vector<16x128xi1>
    %55 = arith.ori %39, %54 : vector<16x128xi1>
    %56 = vector.extract_strided_slice %4 {offsets = [0, 3], sizes = [16, 1], strides = [1, 1]} : vector<16x4xi32> to vector<16x1xi32>
    %57 = vector.broadcast %56 : vector<16x1xi32> to vector<16x128xi32>
    %58 = arith.cmpi eq, %5, %57 : vector<16x128xi32>
    %59 = arith.extui %58 : vector<16x128xi1> to vector<16x128xi32>
    %60 = arith.sitofp %59 : vector<16x128xi32> to vector<16x128xf32>
    %61 = arith.addf %45, %60 : vector<16x128xf32>
    %c96_i32_10 = arith.constant 96 : i32
    %62 = vector.broadcast %c96_i32_10 : i32 to vector<16x128xi32>
    %63 = arith.cmpi sge, %5, %62 : vector<16x128xi32>
    %c128_i32 = arith.constant 128 : i32
    %64 = vector.broadcast %c128_i32 : i32 to vector<16x128xi32>
    %65 = arith.cmpi slt, %5, %64 : vector<16x128xi32>
    %66 = arith.andi %63, %65 : vector<16x128xi1>
    %c0_i32_11 = arith.constant 0 : i32
    %67 = vector.broadcast %c0_i32_11 : i32 to vector<16x1xi32>
    %68 = arith.cmpi sge, %56, %67 : vector<16x1xi32>
    %69 = vector.broadcast %68 : vector<16x1xi1> to vector<16x128xi1>
    %70 = arith.andi %66, %69 : vector<16x128xi1>
    %71 = arith.ori %55, %70 : vector<16x128xi1>
    %72 = math.absf %3 : vector<16x128xf32>
    %cst_12 = arith.constant 0.000000e+00 : f32
    %73 = vector.broadcast %cst_12 : f32 to vector<16x128xf32>
    %74 = arith.subf %73, %72 : vector<16x128xf32>
    %75 = math.exp %74 : vector<16x128xf32>
    %cst_13 = arith.constant 1.000000e+00 : f32
    %76 = vector.broadcast %cst_13 : f32 to vector<16x128xf32>
    %77 = arith.addf %76, %75 : vector<16x128xf32>
    %cst_14 = arith.constant 1.000000e+00 : f32
    %78 = vector.broadcast %cst_14 : f32 to vector<16x128xf32>
    %79 = arith.divf %78, %77 : vector<16x128xf32>
    %cst_15 = arith.constant 0.000000e+00 : f32
    %80 = vector.broadcast %cst_15 : f32 to vector<16x128xf32>
    %81 = arith.cmpf oge, %3, %80 : vector<16x128xf32>
    %82 = arith.mulf %75, %79 : vector<16x128xf32>
    %83 = arith.select %81, %79, %82 : vector<16x128xi1>, vector<16x128xf32>
    %cst_16 = arith.constant 0.000000e+00 : f32
    %84 = vector.broadcast %cst_16 : f32 to vector<16x128xf32>
    %85 = arith.maximumf %3, %84 : vector<16x128xf32>
    %86 = arith.mulf %3, %61 : vector<16x128xf32>
    %87 = arith.subf %85, %86 : vector<16x128xf32>
    %88 = math.log %77 : vector<16x128xf32>
    %89 = arith.addf %87, %88 : vector<16x128xf32>
    %90 = arith.mulf %83, %61 : vector<16x128xf32>
    %cst_17 = arith.constant 1.000000e+00 : f32
    %91 = vector.broadcast %cst_17 : f32 to vector<16x128xf32>
    %92 = arith.subf %91, %83 : vector<16x128xf32>
    %cst_18 = arith.constant 1.000000e+00 : f32
    %93 = vector.broadcast %cst_18 : f32 to vector<16x128xf32>
    %94 = arith.subf %93, %61 : vector<16x128xf32>
    %95 = arith.mulf %92, %94 : vector<16x128xf32>
    %96 = arith.addf %90, %95 : vector<16x128xf32>
    %cst_19 = arith.constant 1.000000e+00 : f32
    %97 = vector.broadcast %cst_19 : f32 to vector<16x128xf32>
    %98 = arith.subf %97, %96 : vector<16x128xf32>
    %99 = arith.mulf %98, %98 : vector<16x128xf32>
    %100 = arith.mulf %89, %99 : vector<16x128xf32>
    %cst_20 = arith.constant 2.500000e-01 : f32
    %101 = vector.broadcast %cst_20 : f32 to vector<16x128xf32>
    %102 = arith.mulf %101, %61 : vector<16x128xf32>
    %cst_21 = arith.constant 1.000000e+00 : f32
    %103 = vector.broadcast %cst_21 : f32 to vector<16x128xf32>
    %104 = arith.subf %103, %61 : vector<16x128xf32>
    %cst_22 = arith.constant 7.500000e-01 : f32
    %105 = vector.broadcast %cst_22 : f32 to vector<16x128xf32>
    %106 = arith.mulf %105, %104 : vector<16x128xf32>
    %107 = arith.addf %102, %106 : vector<16x128xf32>
    %108 = arith.mulf %107, %100 : vector<16x128xf32>
    %cst_23 = arith.constant 0.000000e+00 : f32
    %109 = vector.broadcast %cst_23 : f32 to vector<16x128xf32>
    %110 = arith.select %71, %108, %109 : vector<16x128xi1>, vector<16x128xf32>
    %c0_24 = arith.constant 0 : index
    %c0_25 = arith.constant 0 : index
    %111 = vector.load %arg5[%c0_24, %c0_25] : memref<16x1xf32, #tpu.memory_space<vmem>>, vector<16x1xf32>
    %cst_26 = arith.constant dense<0.000000e+00> : vector<16xf32>
    %112 = vector.multi_reduction <add>, %110, %cst_26 [1] : vector<16x128xf32> to vector<16xf32>
    %113 = vector.shape_cast %112 : vector<16xf32> to vector<16x1xf32>
    %114 = arith.addf %111, %113 : vector<16x1xf32>
    %c0_27 = arith.constant 0 : index
    %c0_28 = arith.constant 0 : index
    %115 = vector.load %arg5[%c0_27, %c0_28] : memref<16x1xf32, #tpu.memory_space<vmem>>, vector<16x1xf32>
    tpu.vector_store %arg5[%c0_27, %c0_28], %114 {strides = array<i32>} : memref<16x1xf32, #tpu.memory_space<vmem>>, vector<16x1xf32>,
    %c0_i32_29 = arith.constant 0 : i32
    %116 = arith.cmpi eq, %arg1, %c0_i32_29 : i32
    %117 = arith.extui %116 : i1 to i32
    %c0_i32_30 = arith.constant 0 : i32
    %118 = arith.cmpi ne, %117, %c0_i32_30 : i32
    scf.if %118 {
      %c0_31 = arith.constant 0 : index
      %c0_32 = arith.constant 0 : index
      %119 = vector.load %arg5[%c0_31, %c0_32] : memref<16x1xf32, #tpu.memory_space<vmem>>, vector<16x1xf32>
      %120 = vector.shape_cast %119 : vector<16x1xf32> to vector<1x16x1xf32>
      %cst_33 = arith.constant dense<0.000000e+00> : vector<1xf32>
      %121 = vector.multi_reduction <add>, %120, %cst_33 [1, 2] : vector<1x16x1xf32> to vector<1xf32>
      %122 = vector.shape_cast %121 : vector<1xf32> to vector<1x1x1xf32>
      %123 = vector.extract %122[0, 0, 0] : f32 from vector<1x1x1xf32>
      %124 = tpu.iota {dimensions = array<i32: 1>} : vector<1x128xi32>
      %c0_i32_34 = arith.constant 0 : i32
      %125 = vector.broadcast %c0_i32_34 : i32 to vector<1x128xi32>
      %126 = arith.cmpi eq, %124, %125 : vector<1x128xi32>
      %cst_35 = arith.constant 0.000000e+00 : f32
      %127 = vector.broadcast %123 : f32 to vector<1x128xf32>
      %128 = vector.broadcast %cst_35 : f32 to vector<1x128xf32>
      %129 = arith.select %126, %127, %128 : vector<1x128xi1>, vector<1x128xf32>
      %c0_36 = arith.constant 0 : index
      %c0_37 = arith.constant 0 : index
      %130 = vector.load %arg4[%c0_36, %c0_37] : memref<1x128xf32, #tpu.memory_space<vmem>>, vector<1x128xf32>
      tpu.vector_store %arg4[%c0_36, %c0_37], %129 {strides = array<i32>} : memref<1x128xf32, #tpu.memory_space<vmem>>, vector<1x128xf32>,
    } else {
    }
    return
  }
  func.func @transform_0(%arg0: i32, %arg1: i32) -> (i32, i32) {
    %c1_i32 = arith.constant 1 : i32
    %0 = arith.muli %arg0, %c1_i32 : i32
    %1 = arith.addi %0, %arg1 : i32
    %c0_i32 = arith.constant 0 : i32
    %c0_i32_0 = arith.constant 0 : i32
    return %1, %c0_i32 : i32, i32
  }
  func.func @transform_1(%arg0: i32, %arg1: i32) -> (i32, i32) {
    %c1_i32 = arith.constant 1 : i32
    %0 = arith.muli %arg0, %c1_i32 : i32
    %1 = arith.addi %0, %arg1 : i32
    %c0_i32 = arith.constant 0 : i32
    %c0_i32_0 = arith.constant 0 : i32
    return %1, %c0_i32 : i32, i32
  }
  func.func @transform_2(%arg0: i32, %arg1: i32) -> (i32, i32) {
    %c0_i32 = arith.constant 0 : i32
    %c0_i32_0 = arith.constant 0 : i32
    return %c0_i32, %arg0 : i32, i32
  }
}

</mosaic_0001>

<bundles_post_ra>
// kernel: tpu_custom_call.1
= control target key start
LH: loop header
LB: loop body
LE: loop exit
PB: predicated region body
PF: predicated region fallthrough
CT: control target
= control target key end

     0   :  { %7 = vsyncpa [#allocation4], 0  ;;  %s934_s0 = inlined_call_operand.vmem [shape: f32[32,128], index: 0, kind: input, shape index: {}]   ;;  %s935_s1 = inlined_call_operand.vmem [shape: s32[32,4], index: 1, kind: input, shape index: {}]   ;;  %s936_s2 = inlined_call_operand.hbm [shape: f32[1,256], index: 2, kind: output, shape index: {}]  }
   0x1   :  { %9 = vsyncpa [#allocation4 + $0x1], 0  ;;  %s708_s9 = smov 0   ;;  %s710_s10 = smov 0  }
   0x2   :  { %s712_s11 = smov 0   ;;  %s714_s12 = smov 0  }
   0x3   :  { %s716_s13 = smov 0   ;;  %s718_s14 = smov 0  }
   0x4 LB: > { %s500_s15 = sadd.s32 4294967295, %s685_s14   ;;  %s501_s16 = sadd.s32 4294967294, %s685_s14   ;;  %s685_s14 = sphi %s718_s14, %s15_s14   ;;  %s681_s13 = sphi %s716_s13, %s957_s13   ;;  %s677_s12 = sphi %s714_s12, %s956_s12   ;;  %s673_s11 = sphi %s712_s11, %s955_s11   ;;  %s669_s10 = sphi %s710_s10, %s954_s10   ;;  %s665_s9 = sphi %s708_s9, %s953_s9  }
   0x5   : > { %s27_s17 = sadd.s32 1, %s681_s13  ;;  %s90_s18 = sadd.s32 1, %s673_s11 }
   0x6   : > { %p29_p0 = scmp.ge.s32.totalorder %s27_s17, 2  ;;  %p100_p1 = scmp.ne.s32.totalorder %s673_s11, %s669_s10 }
   0x7   : > { %p101_p2 = scmp.eq.s32.totalorder %s500_s15, 1  ;;  %p106_p3 = scmp.ne.s32.totalorder %s669_s10, %s665_s9 }
   0x8   : > { %s959_s17 = smov (%p29_p0, %s27_s17), 0  ;;  %p107_p5 = scmp.eq.s32.totalorder %s501_s16, 1 }
   0x9   : > { %p748_p4 = por %p101_p2, %p100_p1  ;;  %s87_s20 = ssub.s32 %s681_s13, %s959_s17 }
   0xa   : > { %p504_p6 = scmp.ge.s32.totalorder %s685_s14, 1  ;;  %p88_p7 = scmp.eq.s32.totalorder %s87_s20, 0 }
   0xb   : > { %p755_p8 = por %p107_p5, %p106_p3  ;;  %p147_p9 = scmp.lt.s32.totalorder %s685_s14, 3 }
   0xc   : > { %s761_s22 = scalar_select %p88_p7, %s673_s11, %s90_s18  }
   0xd   : > { %p148_p10 = pnand %p504_p6, %p147_p9 }
   0xe   : > { %s505_s23 = sshll.u32 (!%p148_p10), %s677_s12, 1  ;;  %v687_v0 = vmov (!%p148_p10), 1   ;;  %v688_v1 = vmov (!%p148_p10), 0   ;;  %v689_v4 = vmov (!%p148_p10), 2   ;;  %v690_v5 = vmov (!%p148_p10), 3   ;;  %s173_s3 = sand.u32 (!%p148_p10), 1, %s669_s10  }
   0xf   : > { %151 = sbr.rel (%p148_p10) target bundleno = 575 (0x23f), region = 28  ;;  %583 = vset.pattern.permute.xlu1 (!%p148_p10), %v687_v0  ;;  %582 = vset.pattern.permute.xlu0 (!%p148_p10), %v688_v1  ;;  %p177_p11 = scmp.lt.s32.totalorder (!%p148_p10), %s505_s23, 3  ;;  %vm195_vm2 = vcmask (!%p148_p10), 7168   ;;  %v691_v8 = vmov (!%p148_p10), 0.0   ;;  %v202_v21 = vlaneseq (!%p148_p10) }
  0x10   : > { %196 = vst.msk [vmem:[#allocation2] sm:$0xff] (!%p148_p10), %vm195_vm2, %v691_v8  ;;  %197 = vst.msk [vmem:[#allocation2 + $0x8] sm:$0xff] (!%p148_p10), %vm195_vm2, %v691_v8  ;;  %s517_s4 = sshll.u32 (!%p148_p10), %s677_s12, 4  ;;  %s174_s5 = scalar_lea.vmem (!%p148_p10), [#allocation3], %s173_s3 }
  0x11   : > { %v785_v24 = vand.u32 (!%p148_p10), 127, %v202_v21  ;;  %s425_s6 = sshll.u32 (!%p148_p10), %s174_s5, 4  ;;  %s887_s16 = scalar_lea.hbm (!%p148_p10), %s936_s2, %s517_s4  ;;  %s889_s6 = int_to_ptr.vmem [resolvable:$true] %s425_s6 }
  0x12   : > { %s413_s18 = scalar_lea.sflag (!%p148_p10), [#allocation4], %s173_s3  ;;  %s607_s12 = scalar_lea.vmem (!%p148_p10), %s889_s6, 16 }
  0x13   : > { %vm249_vm13 = vcmp.ge.s32.totalorder (!%p148_p10), %v785_v24, 32  ;;  %vm250_vm14 = vcmp.lt.s32.totalorder (!%p148_p10), %v785_v24, 64  ;;  %p608_p12 = scmp.ne.s32.totalorder (!%p148_p10), %s889_s6, %s607_s12  ;;  %s692_s20 = smov (!%p148_p10), [#allocation3]  }
  0x14   : > { %vm802_vm15 = vmand (!%p148_p10), %vm249_vm13, %vm250_vm14 }
  0x15   : > { %p609_p13 = pnand (!%p148_p10), %p608_p12, %p748_p4 }
  0x16   : > { %s961_s23 = smov (!%p177_p11, %s505_s23), 3 }
  0x17   : > { %s506_s24 = sshll.u32 %s961_s23, 3  ;;  %p610_p0 = pneg %p609_p13 }
  0x18   : > { %s188_s27 = scalar_lea.vmem %s935_s1, %s506_s24  ;;  %s180_s30 = scalar_lea.vmem %s934_s0, %s506_s24 }
  0x19   : > { %v200_v2 = vld [vmem:[%s188_s27] sm:$0xff]  ;;  %v201_v3 = vld [vmem:[%s188_s27 + $0x8] sm:$0xff]  ;;  %s611_s23 = sshll.u32 %s692_s20, 4  ;;  %s612_s23 = int_to_ptr.vmem [resolvable:$false] %s611_s23 }
  0x1a   : > { %236 = vperm.xlu1 %583, %v200_v2   ;;  %205 = vperm.xlu0 %582, %v200_v2   ;;  %vm221_vm0 = vcmp.ge.s32.totalorder %v200_v2, 0  ;;  %vm222_vm1 = vcmp.ge.s32.totalorder %v201_v3, 0  ;;  %v779_v9 = vld [vmem:[%s180_s30] sm:$0xff]  ;;  %v782_v11 = vld [vmem:[%s180_s30 + $0x8] sm:$0xff]  ;;  %s613_s24 = scalar_lea.vmem %s612_s23, 32  ;;  %p614_p1 = scmp.lt.s32.totalorder %s889_s6, %s612_s23 }
  0x1b   : > { %v223_v6 = vsel %vm221_vm0, 1, %v688_v1  ;;  %v224_v7 = vsel %vm222_vm1, 1, %v688_v1  ;;  %v322_v10 = vand.u32 2147483647, %v779_v9  ;;  %v323_v12 = vand.u32 2147483647, %v782_v11  ;;  %p615_p2 = scmp.lt.s32.totalorder %s613_s24, %s607_s12 }
  0x1c   : > { %vm336_vm9 = vcmp.ge.f32.partialorder %v779_v9, 0.0  ;;  %vm337_vm10 = vcmp.ge.f32.partialorder %v782_v11, 0.0  ;;  %vm219_vm1 = vcmp.lt.s32.totalorder %v785_v24, 32 }
  0x1d   : > { %v324_v13 = vsub.f32 0.0, %v322_v10  ;;  %v325_v14 = vsub.f32 0.0, %v323_v12  ;;  %v343_v12 = vmax.f32 %v782_v11, 0.0  ;;  %p616_p3 = por %p615_p2, %p614_p1 }
  0x1e   : > { %239 = vperm.xlu1 %583, %v201_v3   ;;  %208 = vperm.xlu0 %582, %v201_v3  }
  0x1f   : > { %v326_v15 = vmul.f32 1.442695, %v324_v13  ;;  %v328_v16 = vmul.f32 1.442695, %v325_v14  ;;  %p617_p5 = pnand %p616_p3, %p610_p0 }
  0x21   : > { %595 = vpow2.f32 %v326_v15 }
  0x22   : > { %585 = vset.pattern.permute.xlu1 %v689_v4  ;;  %584 = vset.pattern.permute.xlu0 %v689_v4  ;;  %597 = vpow2.f32 %v328_v16 }
  0x23   : > { %268 = vperm.xlu1 %585, %v201_v3   ;;  %265 = vperm.xlu0 %584, %v200_v2  }
  0x27   : > { %586 = vset.pattern.permute.xlu1 %v690_v5  ;;  %587 = vset.pattern.permute.xlu0 %v690_v5 }
  0x28   : > { %294 = vperm.xlu1 %586, %v200_v2   ;;  %297 = vperm.xlu0 %587, %v201_v3  }
  0x2b   : > { %v596_v17 = vpop.eup %595 }
  0x2c   : > { %588 = vset.pattern.permute.xlu1 %v688_v1  ;;  %589 = vset.pattern.permute.xlu0 %v687_v0  ;;  %v330_v18 = vadd.f32 1.0, %v596_v17  ;;  %v598_v19 = vpop.eup %597 }
  0x2d   : > { %253 = vperm.xlu0 %589, %v223_v6   ;;  %226 = vperm.xlu1 %588, %v223_v6   ;;  %v331_v20 = vadd.f32 1.0, %v598_v19 }
  0x2e   : > { %599 = vrcp.f32 %v330_v18 }
  0x2f   : > { %601 = vrcp.f32 %v331_v20 }
  0x30   : > { %603 = vlog2.f32 %v330_v18 }
  0x31   : > { %229 = vperm.xlu1 %588, %v224_v7   ;;  %592 = vset.pattern.permute.xlu0 %v689_v4  ;;  %605 = vlog2.f32 %v331_v20 }
  0x32   : > { %285 = vperm.xlu0 %592, %v224_v7  }
  0x35   : > { %590 = vset.pattern.permute.xlu1 %v687_v0  ;;  %v342_v0 = vmax.f32 %v779_v9, 0.0 }
  0x36   : > { %256 = vperm.xlu1 %590, %v224_v7   ;;  %594 = vset.pattern.permute.xlu0 %v690_v5 }
  0x38   : > { %v600_v27 = vpop.eup %599 }
  0x39   : > { %v338_v32 = vmul.f32 %v600_v27, %v596_v17  ;;  %v602_v33 = vpop.eup %601 }
  0x3a   : > { %591 = vset.pattern.permute.xlu1 %v689_v4  ;;  %v339_v40 = vmul.f32 %v602_v33, %v598_v19  ;;  %v604_v62 = vpop.eup %603 }
  0x3b   : > { %282 = vperm.xlu1 %591, %v223_v6   ;;  %v340_v43 = vsel %vm336_vm9, %v600_v27, %v338_v32  ;;  %v349_v10 = vmul.f32 0.6931472, %v604_v62 }
  0x3c   : > { %v356_v50 = vsub.f32 1.0, %v340_v43  ;;  %v341_v51 = vsel %vm337_vm10, %v602_v33, %v339_v40 }
  0x3d   : > { %v357_v54 = vsub.f32 1.0, %v341_v51 }
  0x3f   : > { %593 = vset.pattern.permute.xlu1 %v690_v5 }
  0x40   : > { %311 = vperm.xlu1 %593, %v223_v6  }
  0x44   : > { %314 = vperm.xlu1 %593, %v224_v7   ;;  %v606_v7 = vpop.eup %605 }
  0x45   : > { %v351_v20 = vmul.f32 0.6931472, %v606_v7 }
  0x99   : > { %v237_v22 = vpop.permute.xlu1 %236  ;;  %v206_v23 = vpop.permute.xlu0 %205 }
  0x9a   : > { %vm241_vm3 = vcmp.eq.s32.totalorder %v785_v24, %v237_v22  ;;  %vm210_vm4 = vcmp.eq.s32.totalorder %v785_v24, %v206_v23 }
  0x9b   : > { %v511_v28 = vsel %vm241_vm3, 1.0, %v691_v8  ;;  %v509_v29 = vsel %vm210_vm4, 1.0, %v691_v8 }
  0x9c   : > { %v247_v38 = vadd.f32 %v511_v28, %v509_v29 }
  0x9d   : > { %v240_v25 = vpop.permute.xlu1 %239  ;;  %v209_v26 = vpop.permute.xlu0 %208 }
  0x9e   : > { %vm242_vm5 = vcmp.eq.s32.totalorder %v785_v24, %v240_v25  ;;  %vm211_vm6 = vcmp.eq.s32.totalorder %v785_v24, %v209_v26 }
  0x9f   : > { %v512_v34 = vsel %vm242_vm5, 1.0, %v691_v8  ;;  %v510_v35 = vsel %vm211_vm6, 1.0, %v691_v8  ;;  %vm278_vm5 = vcmp.ge.s32.totalorder %v785_v24, 64  ;;  %vm279_vm6 = vcmp.lt.s32.totalorder %v785_v24, 96 }
  0xa0   : > { %v248_v39 = vadd.f32 %v512_v34, %v510_v35  ;;  %vm827_vm10 = vmand %vm278_vm5, %vm279_vm6  ;;  %vm307_vm5 = vcmp.ge.s32.totalorder %v785_v24, 96 }
  0xa2   : > { %v269_v30 = vpop.permute.xlu1 %268  ;;  %v266_v31 = vpop.permute.xlu0 %265 }
  0xa3   : > { %vm271_vm7 = vcmp.eq.s32.totalorder %v785_v24, %v269_v30  ;;  %vm270_vm8 = vcmp.eq.s32.totalorder %v785_v24, %v266_v31 }
  0xa4   : > { %v514_v36 = vsel %vm271_vm7, 1.0, %v691_v8  ;;  %v513_v37 = vsel %vm270_vm8, 1.0, %v691_v8 }
  0xa5   : > { %v277_v44 = vadd.f32 %v514_v36, %v248_v39  ;;  %v276_v45 = vadd.f32 %v513_v37, %v247_v38 }
  0xa7   : > { %v295_v41 = vpop.permute.xlu1 %294  ;;  %v298_v42 = vpop.permute.xlu0 %297 }
  0xa8   : > { %vm299_vm11 = vcmp.eq.s32.totalorder %v785_v24, %v295_v41  ;;  %vm300_vm12 = vcmp.eq.s32.totalorder %v785_v24, %v298_v42  ;;  %v380_v41 = vld [vmem:[#allocation2] sm:$0xff] }
  0xa9   : > { %v515_v46 = vsel %vm299_vm11, 1.0, %v691_v8  ;;  %v516_v47 = vsel %vm300_vm12, 1.0, %v691_v8 }
  0xaa   : > { %v305_v48 = vadd.f32 %v515_v46, %v276_v45  ;;  %v797_v49 = vadd.f32 %v516_v47, %v277_v44  ;;  %v381_v44 = vld [vmem:[#allocation2 + $0x8] sm:$0xff] }
  0xac   : > { %v227_v52 = vpop.permute.xlu1 %226  ;;  %v358_v53 = vsub.f32 1.0, %v305_v48  ;;  %v359_v56 = vsub.f32 1.0, %v797_v49  ;;  %v354_v57 = vmul.f32 %v340_v43, %v305_v48  ;;  %v254_v58 = vpop.permute.xlu0 %253  ;;  %v344_v1 = vmul.f32 %v305_v48, %v779_v9 }
  0xad   : > { %vm258_vm0 = vcmp.eq.s32.totalorder %v254_v58, 1  ;;  %v355_v2 = vmul.f32 %v341_v51, %v797_v49  ;;  %vm231_vm3 = vcmp.eq.s32.totalorder %v227_v52, 1  ;;  %v345_v13 = vmul.f32 %v797_v49, %v782_v11 }
  0xae   : > { %v360_v55 = vmul.f32 %v358_v53, %v356_v50  ;;  %v361_v61 = vmul.f32 %v359_v56, %v357_v54  ;;  %vm812_vm4 = vmand %vm802_vm15, %vm258_vm0  ;;  %v346_v9 = vsub.f32 %v342_v0, %v344_v1  ;;  %v372_v19 = vmul.f32 0.75, %v358_v53 }
  0xaf   : > { %vm820_vm7 = vmand %vm219_vm1, %vm231_vm3  ;;  %v347_v22 = vsub.f32 %v343_v12, %v345_v13  ;;  %v370_v26 = vmul.f32 0.25, %v305_v48  ;;  %v373_v32 = vmul.f32 0.75, %v359_v56  ;;  %v371_v35 = vmul.f32 0.25, %v797_v49 }
  0xb0   : > { %v230_v59 = vpop.permute.xlu1 %229  ;;  %v362_v60 = vadd.f32 %v360_v55, %v354_v57  ;;  %v363_v5 = vadd.f32 %v361_v61, %v355_v2  ;;  %vm262_vm11 = vmor %vm820_vm7, %vm812_vm4  ;;  %v352_v21 = vadd.f32 %v349_v10, %v346_v9 }
  0xb1   : > { %vm232_vm8 = vcmp.eq.s32.totalorder %v230_v59, 1  ;;  %v286_v14 = vpop.permute.xlu0 %285  ;;  %v374_v30 = vadd.f32 %v372_v19, %v370_v26  ;;  %v353_v31 = vadd.f32 %v351_v20, %v347_v22  ;;  %v375_v38 = vadd.f32 %v373_v32, %v371_v35 }
  0xb2   : > { %v364_v4 = vsub.f32 1.0, %v362_v60  ;;  %v365_v17 = vsub.f32 1.0, %v363_v5  ;;  %vm837_vm12 = vmand %vm219_vm1, %vm232_vm8  ;;  %vm288_vm13 = vcmp.eq.s32.totalorder %v286_v14, 1 }
  0xb3   : > { %vm851_vm1 = vmand %vm827_vm10, %vm288_vm13 }
  0xb4   : > { %v366_v16 = vmul.f32 %v364_v4, %v364_v4  ;;  %v367_v27 = vmul.f32 %v365_v17, %v365_v17 }
  0xb5   : > { %v257_v3 = vpop.permute.xlu1 %256 }
  0xb6   : > { %vm259_vm9 = vcmp.eq.s32.totalorder %v257_v3, 1  ;;  %v368_v25 = vmul.f32 %v366_v16, %v352_v21  ;;  %v369_v34 = vmul.f32 %v367_v27, %v353_v31 }
  0xb7   : > { %vm843_vm0 = vmand %vm802_vm15, %vm259_vm9 }
  0xb8   : > { %vm263_vm15 = vmor %vm837_vm12, %vm843_vm0  ;;  %v376_v33 = vmul.f32 %v374_v30, %v368_v25  ;;  %v377_v39 = vmul.f32 %v375_v38, %v369_v34  ;;  %vm408_vm12 = vcmp.eq.s32.totalorder %v785_v24, 0 }
  0xb9   : > { %vm292_vm4 = vmor %vm263_vm15, %vm851_vm1 }
  0xba   : > { %v283_v18 = vpop.permute.xlu1 %282 }
  0xbb   : > { %vm287_vm14 = vcmp.eq.s32.totalorder %v283_v18, 1 }
  0xbc   : > { %vm289_vm3 = vmand %vm827_vm10, %vm287_vm14 }
  0xbd   : > { %vm291_vm8 = vmor %vm262_vm11, %vm289_vm3 }
  0xbf   : > { %v312_v29 = vpop.permute.xlu1 %311 }
  0xc0   : > { %vm316_vm6 = vcmp.eq.s32.totalorder %v312_v29, 1 }
  0xc1   : > { %vm318_vm9 = vmand %vm307_vm5, %vm316_vm6 }
  0xc2   : > { %vm320_vm10 = vmor %vm291_vm8, %vm318_vm9 }
  0xc3   : > { %v315_v36 = vpop.permute.xlu1 %314  ;;  %v378_v37 = vsel %vm320_vm10, %v376_v33, 0.0 }
  0xc4   : > { %vm317_vm13 = vcmp.eq.s32.totalorder %v315_v36, 1  ;;  %382 = vadd.xlane.f32.xlu0 %v378_v37 }
  0xc5   : > { %vm319_vm7 = vmand %vm307_vm5, %vm317_vm13 }
  0xc6   : > { %vm321_vm11 = vmor %vm292_vm4, %vm319_vm7 }
  0xc7   : > { %v379_v40 = vsel %vm321_vm11, %v377_v39, 0.0 }
  0xc8   : > { %384 = vadd.xlane.f32.xlu1 %v379_v40 }
 0x151   : > { %v383_v42 = vpop.xlane.xlu0 %382 }
 0x152   : > { %v386_v43 = vadd.f32 %v383_v42, %v380_v41 }
 0x154   : > { %389 = vst.msk [vmem:[#allocation2] sm:$0xff] %vm195_vm2, %v386_v43 }
 0x155   : > { %v385_v45 = vpop.xlane.xlu1 %384 }
 0x156   : > { %v387_v46 = vadd.f32 %v385_v45, %v381_v44 }
 0x158   : > { %390 = vst.msk [vmem:[#allocation2 + $0x8] sm:$0xff] %vm195_vm2, %v387_v46 }
 0x15b   : > { %v394_v47 = vld [vmem:[#allocation2] sm:$0xff] }
 0x15c   : > { %v396_v49 = vsel %vm195_vm2, %v394_v47, 0.0 }
 0x15f   : > { %v395_v48 = vld [vmem:[#allocation2 + $0x8] sm:$0xff] }
 0x160   : > { %v397_v50 = vsel %vm195_vm2, %v395_v48, 0.0 }
 0x161   : > { %v398_v51 = vadd.f32 %v397_v50, %v396_v49 }
 0x163   : > { %399 = vadd.xlane.f32.xlu0 %v398_v51 }
 0x1f0   : > { %v400_v52 = vpop.xlane.xlu0 %399 }
 0x1f1   : > { %v401_v53 = vrot.slane %v400_v52, 4 }
 0x1f3   : > { %v402_v54 = vadd.f32 %v401_v53, %v400_v52 }
 0x1f5   : > { %v403_v55 = vrot.slane %v402_v54, 2 }
 0x1f7   : > { %v404_v56 = vadd.f32 %v403_v55, %v402_v54 }
 0x1f9   : > { %v405_v57 = vrot.slane %v404_v56, 1 }
 0x1fb   : > { %v406_v58 = vadd.f32 %v405_v57, %v404_v56 }
 0x1fd   : > { %520 = vpush %v406_v58 }
 0x22e   : > { %s521_s7 = spop %520 }
 0x22f   : > { %v409_v59 = vstv %s521_s7 }
 0x230   : > { %v410_v60 = vsel %vm408_vm12, %v409_v59, 0.0 }
 0x231   : > { %411 = vst [vmem:[%s174_s5] sm:$0x1] %v410_v60 }
 0x232   : > { %620 = shalt.err (!%p617_p5)
}
 0x233   : > { %s621_s25 = scalar_lea.hbm %s887_s16, 16  ;;  %s625_s28 = scalar_lea.hbm %s936_s2, 32 }
 0x234   : > { %p622_p6 = scmp.ne.s32.totalorder %s887_s16, %s621_s25  ;;  %p626_p10 = scmp.lt.u32.totalorder %s887_s16, %s936_s2 }
 0x235   : > { %p627_p11 = scmp.lt.u32.totalorder %s625_s28, %s621_s25  ;;  %p629_p13 = scmp.lt.u32.totalorder %s621_s25, %s887_s16 }
 0x236   : > { %p623_p7 = pnand %p622_p6, %p748_p4 }
 0x237   : > { %p628_p12 = por %p627_p11, %p626_p10 }
 0x238   : > { %p624_p9 = pneg %p623_p7 }
 0x239   : > { %p630_p0 = por %p629_p13, %p628_p12 }
 0x23b   : > { %p631_p1 = pnand %p630_p0, %p624_p9 }
 0x23d   : > { %634 = shalt.err (!%p631_p1)
}
 0x23e   : > { %522 = dma.vmem_to_hbm [thread:$0]  (%p748_p4), %s889_s6, 16, %s887_s16, %s413_s18  }
 0x23f PF: > { %p528_p2 = scmp.ge.s32.totalorder %s685_s14, 2  ;;  %s437_s3 = sand.u32 1, %s665_s9  }
 0x240   : > { %s438_s4 = scalar_lea.sflag [#allocation4], %s437_s3 }
 0x241   : > { %p525_p3 = pnand %p528_p2, %p755_p8 }
 0x243   : > { %660 = dma.done.wait (!%p525_p3), %s438_s4, 16  }
 0x244   : > { %662 = vsyncadd (!%p525_p3), %s438_s4, 4294967280  ;;  %s15_s14 = sadd.s32 1, %s685_s14   ;;  %s953_s9 = smov %s669_s10 }
 0x245   : > { %p12_p5 = scmp.ge.s32.totalorder %s15_s14, 4   ;;  %s954_s10 = smov %s673_s11 }
 0x246   : > { %s955_s11 = smov %s761_s22  ;;  %s956_s12 = smov %s681_s13 }
 0x247   : > { %s957_s13 = smov %s959_s17  ;;  %14 = sbr.rel (!%p12_p5) target bundleno = 4 (0x4), region = 74 }
 0x24e   :  { %442 = vsyncpa [#allocation4], 1 }
 0x24f   :  { %444 = vsyncpa [#allocation4 + $0x1], 1 }

</bundles_post_ra>
